<compile_context>
chip_gen: v7x
topology: tpu7x:2x2x1
jax: 0.10.0
libtpu: 0.0.40
codegen_flags: <defaults>
</compile_context>

<pallas_src>
import math

import jax
import jax.numpy as jnp
from jax.experimental import pallas as pl
from jax.experimental.pallas import tpu as pltpu


def _round_up(x, m):
    return (x + m - 1) // m * m


def _cdiv(a, b):
    return (a + b - 1) // b


def _vmem_tile_bytes(rows, cols, itemsize):
    # Conservative VMEM footprint of one tile (sublane/lane padding).
    return _round_up(max(rows, 1), 8) * _round_up(max(cols, 1), 128) * itemsize


# ----------------------------- Pallas kernels --------------------------------
def _gemm_bias_silu_kernel(p_ref, w_ref, b_ref, o_ref):
    """Single-K-tile: o = SiLU(P @ W + b). No accumulator scratch."""
    acc = jnp.dot(p_ref[...], w_ref[...], preferred_element_type=jnp.float32)
    acc = acc + b_ref[...]                                    # f32 bias broadcast
    sig = pl.reciprocal(1.0 + jnp.exp(-acc), approx=True)     # EUP exp + vrcp
    o_ref[...] = (acc * sig).astype(o_ref.dtype)


def _gemm_bias_silu_acc_kernel(p_ref, w_ref, b_ref, o_ref, acc_ref):
    """Multi-K-tile: K reduced over grid axis 2 with an f32 VMEM accumulator."""
    k = pl.program_id(2)

    @pl.when(k == 0)
    def _init():
        acc_ref[...] = jnp.zeros_like(acc_ref)

    acc_ref[...] += jnp.dot(p_ref[...], w_ref[...],
                            preferred_element_type=jnp.float32)

    @pl.when(k == pl.num_programs(2) - 1)
    def _finalize():
        acc = acc_ref[...] + b_ref[...]
        sig = pl.reciprocal(1.0 + jnp.exp(-acc), approx=True)
        o_ref[...] = (acc * sig).astype(o_ref.dtype)


def _conv_gemm_silu(patches, w_mat, bias_row, *, tm_default=1024):
    """patches: [M, K] bf16, w_mat: [K, Nc] bf16, bias_row: [1, Nc] f32.

    Returns [M, Nc] bfloat16 = SiLU(patches @ w_mat + bias).
    Caller guarantees K % 512 == 0 when K > 2048 and Nc % 128 == 0 when
    Nc > 512 (otherwise no padding is needed: full-dim blocks are used).
    """
    M, K = patches.shape
    Nc = w_mat.shape[1]

    # Output-channel tiling (no pad for small Nc: one full-dim block).
    if Nc <= 512:
        tn = Nc
    elif Nc % 256 == 0:
        tn = 256
    else:
        tn = 128
    num_n = _cdiv(Nc, tn)

    # Contraction tiling (single full-K block in the common case).
    tk = K if K <= 2048 else 512
    num_k = _cdiv(K, tk)

    # M tiling: never pad M; ensure >= 2 parallel blocks for megacore (v7x).
    tm = min(tm_default, _round_up(M, 8))
    if M > 256 and _cdiv(M, tm) < 2 and num_n < 2:
        tm = _round_up(_cdiv(M, 2), 8)
    num_m = _cdiv(M, tm)

    # VMEM budget ~= 2x the actual (double-buffered) working set.
    est = 2 * (_vmem_tile_bytes(tm, tk, 2) + _vmem_tile_bytes(tk, tn, 2)
               + _vmem_tile_bytes(1, tn, 4) + _vmem_tile_bytes(tm, tn, 2))
    if num_k > 1:
        est += (_vmem_tile_bytes(tm, tn, 4)          # f32 accumulator
                + _vmem_tile_bytes(tm, tk, 2) + _vmem_tile_bytes(tk, tn, 2))
    vmem_limit = int(min(max(2 * est, 8 * 1024 * 1024), 40 * 1024 * 1024))

    if num_k == 1:
        grid = (num_m, num_n)
        in_specs = [
            pl.BlockSpec((tm, K), lambda i, j: (i, 0)),    # patches tile
            pl.BlockSpec((K, tn), lambda i, j: (0, j)),    # weight tile
            pl.BlockSpec((1, tn), lambda i, j: (0, j)),    # bias tile
        ]
        out_specs = pl.BlockSpec((tm, tn), lambda i, j: (i, j))
        kernel = _gemm_bias_silu_kernel
        scratch = []
        dims = ("parallel", "parallel")
    else:
        grid = (num_m, num_n, num_k)
        in_specs = [
            pl.BlockSpec((tm, tk), lambda i, j, k: (i, k),
                         pipeline_mode=pl.Buffered(3)),
            pl.BlockSpec((tk, tn), lambda i, j, k: (k, j),
                         pipeline_mode=pl.Buffered(3)),
            pl.BlockSpec((1, tn), lambda i, j, k: (0, j)),
        ]
        out_specs = pl.BlockSpec((tm, tn), lambda i, j, k: (i, j))
        kernel = _gemm_bias_silu_acc_kernel
        scratch = [pltpu.VMEM((tm, tn), jnp.float32)]
        dims = ("parallel", "parallel", "arbitrary")

    return pl.pallas_call(
        kernel,
        out_shape=jax.ShapeDtypeStruct((M, Nc), jnp.bfloat16),
        grid_spec=pltpu.PrefetchScalarGridSpec(
            num_scalar_prefetch=0,
            grid=grid,
            in_specs=in_specs,
            out_specs=out_specs,
            scratch_shapes=scratch,
        ),
        compiler_params=pltpu.CompilerParams(
            dimension_semantics=dims,
            vmem_limit_bytes=vmem_limit,
        ),
    )(patches, w_mat, bias_row)


# ------------------------------ glue (im2col) ---------------------------------
def _im2col_nhwc_s2_p1_k3(x_nchw, dtype=jnp.bfloat16):
    """x: [N, C, H, W] -> patches [N*Ho*Wo, 9*C] with K ordered (kh, kw, c)."""
    N, C, H, W = x_nchw.shape
    Ho = (H + 2 - 3) // 2 + 1
    Wo = (W + 2 - 3) // 2 + 1
    x_nhwc = jnp.transpose(x_nchw.astype(dtype), (0, 2, 3, 1))      # NHWC, bf16
    xp = jnp.pad(x_nhwc, ((0, 0), (1, 1), (1, 1), (0, 0)))
    taps = [xp[:, kh:kh + 2 * Ho:2, kw:kw + 2 * Wo:2, :]
            for kh in range(3) for kw in range(3)]                   # [N,Ho,Wo,C]
    patches = jnp.concatenate(taps, axis=-1)                         # [N,Ho,Wo,9C]
    return patches.reshape(N * Ho * Wo, 9 * C), (N, Ho, Wo)


def down_block_forward(x_nchw, weight, bias):
    """weight: [C_out, C_in, 3, 3] (PyTorch OIHW), bias: [C_out]. Returns NCHW f32."""
    C_out, C_in = weight.shape[0], weight.shape[1]
    patches, (N, Ho, Wo) = _im2col_nhwc_s2_p1_k3(x_nchw)
    M, K = patches.shape

    # Weight -> [K, C_out] with K ordered (kh, kw, c) to match the patches.
    w_mat = jnp.transpose(weight, (2, 3, 1, 0)).reshape(K, C_out).astype(jnp.bfloat16)
    bias_row = bias.astype(jnp.float32).reshape(1, C_out)

    # Pad only in the rare large cases (keeps the big-shape path lane-dense).
    if K > 2048:
        Kp = _round_up(K, 512)
        patches = jnp.pad(patches, ((0, 0), (0, Kp - K)))
        w_mat = jnp.pad(w_mat, ((0, Kp - K), (0, 0)))
    if C_out > 512 and C_out % 128 != 0:
        Np = _round_up(C_out, 128)
        w_mat = jnp.pad(w_mat, ((0, 0), (0, Np - C_out)))
        bias_row = jnp.pad(bias_row, ((0, 0), (0, Np - C_out)))

    out = _conv_gemm_silu(patches, w_mat, bias_row)                  # [M, Np] bf16
    out = out[:, :C_out].reshape(N, Ho, Wo, C_out)
    # NHWC -> NCHW for module parity; f32 upcast fuses into the transpose.
    return jnp.transpose(out, (0, 3, 1, 2)).astype(jnp.float32)


# --------------------------------- main ----------------------------------------
if __name__ == "__main__":
    key = jax.random.PRNGKey(0)
    N, C_in, H, W = 2, 4, 16, 16
    C_out = 8

    kx, kw_, kb = jax.random.split(key, 3)
    x = jax.random.normal(kx, (N, C_in, H, W), dtype=jnp.float32)

    # Deterministic init mimicking PyTorch Conv2d default (+/- 1/sqrt(fan_in)).
    fan_in = C_in * 3 * 3
    bound = 1.0 / math.sqrt(fan_in)
    weight = jax.random.uniform(kw_, (C_out, C_in, 3, 3),
                                minval=-bound, maxval=bound, dtype=jnp.float32)
    bias = jax.random.uniform(kb, (C_out,),
                              minval=-bound, maxval=bound, dtype=jnp.float32)

    out = jax.jit(down_block_forward)(x, weight, bias)
    out = jax.block_until_ready(out)

    # Reference: XLA f32 conv + SiLU (kernel uses bf16 MXU inputs/outputs, so
    # tolerance is loosened accordingly).
    ref = jax.lax.conv_general_dilated(
        x, weight, window_strides=(2, 2), padding=((1, 1), (1, 1)),
        dimension_numbers=("NCHW", "OIHW", "NCHW"))
    ref = ref + bias[None, :, None, None]
    ref = ref * jax.nn.sigmoid(ref)

    assert out.shape == (N, C_out, H // 2, W // 2), out.shape
    max_err = float(jnp.max(jnp.abs(out - ref)))
    assert jnp.allclose(out, ref, atol=3e-2, rtol=3e-2), max_err

    print("KERNEL_OK")
</pallas_src>

<mosaic_0001>
module attributes {stable_mosaic.version = 11 : i64} {
  func.func @_gemm_bias_silu_kernel(%arg0: i32, %arg1: i32, %arg2: memref<128x36xbf16, #tpu.memory_space<vmem>>, %arg3: memref<36x8xbf16, #tpu.memory_space<vmem>>, %arg4: memref<1x8xf32, #tpu.memory_space<vmem>>, %arg5: memref<128x8xbf16, #tpu.memory_space<vmem>>) attributes {dimension_semantics = [#tpu.dimension_semantics<parallel>, #tpu.dimension_semantics<parallel>], iteration_bounds = array<i64: 1, 1>, scalar_prefetch = 0 : i64, scratch_operands = 0 : i64, tpu.core_type = #tpu.core_type<tc>, window_params = [{transform_indices = @transform_0, window_bounds = array<i64: 128, 36>}, {transform_indices = @transform_1, window_bounds = array<i64: 36, 8>}, {transform_indices = @transform_2, window_bounds = array<i64: 1, 8>}, {transform_indices = @transform_3, window_bounds = array<i64: 128, 8>}]} {
    %c0 = arith.constant 0 : index
    %c0_0 = arith.constant 0 : index
    %0 = vector.load %arg2[%c0, %c0_0] : memref<128x36xbf16, #tpu.memory_space<vmem>>, vector<128x36xbf16>
    %c0_1 = arith.constant 0 : index
    %c0_2 = arith.constant 0 : index
    %1 = vector.load %arg3[%c0_1, %c0_2] : memref<36x8xbf16, #tpu.memory_space<vmem>>, vector<36x8xbf16>
    %cst = arith.constant dense<0.000000e+00> : vector<128x8xf32>
    %2 = tpu.matmul %0, %1, %cst {dimension_numbers = #tpu.dot_dimension_numbers<[1], [0], [0], [1], [0, 0, 1, 1], [], []>} : vector<128x36xbf16>, vector<36x8xbf16>, vector<128x8xf32> -> vector<128x8xf32>
    %c0_3 = arith.constant 0 : index
    %c0_4 = arith.constant 0 : index
    %3 = vector.load %arg4[%c0_3, %c0_4] : memref<1x8xf32, #tpu.memory_space<vmem>>, vector<1x8xf32>
    %4 = vector.broadcast %3 : vector<1x8xf32> to vector<128x8xf32>
    %5 = arith.addf %2, %4 : vector<128x8xf32>
    %cst_5 = arith.constant 0.000000e+00 : f32
    %6 = vector.broadcast %cst_5 : f32 to vector<128x8xf32>
    %7 = arith.subf %6, %5 : vector<128x8xf32>
    %8 = math.exp %7 : vector<128x8xf32>
    %cst_6 = arith.constant 1.000000e+00 : f32
    %9 = vector.broadcast %cst_6 : f32 to vector<128x8xf32>
    %10 = arith.addf %9, %8 : vector<128x8xf32>
    %11 = tpu.reciprocal %10 {approx = true} : vector<128x8xf32> -> vector<128x8xf32>
    %12 = arith.mulf %5, %11 : vector<128x8xf32>
    %13 = arith.truncf %12 : vector<128x8xf32> to vector<128x8xbf16>
    %c0_7 = arith.constant 0 : index
    %c0_8 = arith.constant 0 : index
    %14 = vector.load %arg5[%c0_7, %c0_8] : memref<128x8xbf16, #tpu.memory_space<vmem>>, vector<128x8xbf16>
    tpu.vector_store %arg5[%c0_7, %c0_8], %13 {strides = array<i32>} : memref<128x8xbf16, #tpu.memory_space<vmem>>, vector<128x8xbf16>,
    return
  }
  func.func @transform_0(%arg0: i32, %arg1: i32) -> (i32, i32) {
    %c0_i32 = arith.constant 0 : i32
    %c0_i32_0 = arith.constant 0 : i32
    return %arg0, %c0_i32 : i32, i32
  }
  func.func @transform_1(%arg0: i32, %arg1: i32) -> (i32, i32) {
    %c0_i32 = arith.constant 0 : i32
    %c0_i32_0 = arith.constant 0 : i32
    return %c0_i32, %arg1 : i32, i32
  }
  func.func @transform_2(%arg0: i32, %arg1: i32) -> (i32, i32) {
    %c0_i32 = arith.constant 0 : i32
    %c0_i32_0 = arith.constant 0 : i32
    return %c0_i32, %arg1 : i32, i32
  }
  func.func @transform_3(%arg0: i32, %arg1: i32) -> (i32, i32) {
    %c0_i32 = arith.constant 0 : i32
    return %arg0, %arg1 : i32, i32
  }
}

</mosaic_0001>

<bundles_post_ra>
// kernel: down_block_forward.1
= control target key start
LH: loop header
LB: loop body
LE: loop exit
PB: predicated region body
PF: predicated region fallthrough
CT: control target
= control target key end

     0   :  { %vm98_vm0 = vcmask 293888   ;;  %vm123_vm1 = vcmask 1041408   ;;  %vm384_vm2 = vcmask 60416   ;;  %s783_s1 = inlined_call_operand.vmem [shape: bf16[36,8], index: 1, kind: input, shape index: {}]   ;;  %s784_s0 = inlined_call_operand.vmem [shape: bf16[128,36], index: 0, kind: input, shape index: {}]   ;;  %s785_s2 = inlined_call_operand.vmem [shape: f32[1,8], index: 2, kind: input, shape index: {}]   ;;  %s786_s3 = inlined_call_operand.vmem [shape: bf16[128,8], index: 3, kind: output, shape index: {}]  }
   0x1   :  { %v498_v0 = vld [vmem:[%s783_s1] sm:$0xff]   ;;  %v499_v1 = vld [vmem:[%s783_s1 + $0x8] sm:$0xff]   ;;  %v500_v2 = vld [vmem:[%s783_s1 + $0x10] ss:$0 sps:$4 sm:$0x33]  }
   0x2   :  { %468 = vmatprep.subr.bf16.mxu0 %v498_v0  ;;  %490 = vmatprep.subr.bf16.mxu1 %v498_v0  ;;  %v501_v3 = vld [vmem:[%s784_s0] sm:$0xff]   ;;  %v125_v5 = vsel %vm123_vm1, %v500_v2, 0  ;;  %v503_v6 = vld [vmem:[%s784_s0 + $0x8] sm:$0xff]   ;;  %v505_v8 = vld [vmem:[%s784_s0 + $0x10] sm:$0xff]  }
   0x3   :  { %469 = vmatpush3.bf16.msra.mxu0 %v498_v0  ;;  %493 = vmatpush3.bf16.msra.mxu1 %v498_v0  ;;  %v502_v4 = vld [vmem:[%s784_s0 + $0x20] sm:$0xff]   ;;  %v504_v7 = vld [vmem:[%s784_s0 + $0x28] sm:$0xff]   ;;  %v506_v9 = vld [vmem:[%s784_s0 + $0x30] sm:$0xff]  }
   0x4   :  { %470 = vmatprep.subr.bf16.mxu0 %v499_v1  ;;  %491 = vmatprep.subr.bf16.mxu1 %v499_v1  ;;  %v507_v10 = vld [vmem:[%s784_s0 + $0x18] sm:$0xff]   ;;  %v637_v12 = vld [vmem:[%s785_s2] ss:$0 sm:$0xff] }
   0x5   :  { %474 = vmatprep.mubr.msk.bf16.mxu0 %vm98_vm0, %v501_v3  ;;  %482 = vmatprep.mubr.msk.bf16.mxu1 %vm98_vm0, %v502_v4  ;;  %v508_v11 = vld [vmem:[%s784_s0 + $0x38] sm:$0xff]  }
   0x7   :  { %471 = vmatpush3.bf16.msra.mxu0 %v499_v1  ;;  %494 = vmatpush3.bf16.msra.mxu1 %v499_v1 }
   0x8   :  { %496 = vmatprep.subr.msk.bf16.mxu0 %vm123_vm1, %v500_v2  ;;  %497 = vmatprep.subr.msk.bf16.mxu1 %vm123_vm1, %v500_v2 }
   0xb   :  { %473 = vmatpush3.bf16.msra.mxu0 %v125_v5  ;;  %495 = vmatpush3.bf16.msra.mxu1 %v125_v5 }
   0xe   :  { %475 = vmatmul.mubr.msk.bf16.vlgmr.msra.gmra.mrb[0].mxu0 %vm98_vm0, %v503_v6  ;;  %483 = vmatmul.mubr.msk.bf16.vlgmr.msra.gmra.mrb[0].mxu1 %vm98_vm0, %v504_v7 }
   0xf   :  { %478 = vmatprep.mubr.msk.bf16.mxu0 %vm98_vm0, %v505_v8  ;;  %486 = vmatprep.mubr.msk.bf16.mxu1 %vm98_vm0, %v506_v9 }
  0x16   :  { %479 = vmatmul.mubr.msk.bf16.gmra.mrb[4].mxu0 %vm98_vm0, %v507_v10  ;;  %487 = vmatmul.mubr.msk.bf16.gmra.mrb[4].mxu1 %vm98_vm0, %v508_v11 }
  0xe1   :  { %v476_v13 = vpop.f32.mrb[0].mxu0  ;;  %v484_v14 = vpop.f32.mrb[0].mxu1 }
  0xe2   :  { %v640_v15 = vadd.f32 %v476_v13, %v637_v12  ;;  %v643_v16 = vadd.f32 %v484_v14, %v637_v12  ;;  %v161_v17 = vpop.f32.mrb[1].mxu0  ;;  %v193_v18 = vpop.f32.mrb[1].mxu1 }
  0xe3   :  { %v646_v19 = vadd.f32 %v637_v12, %v161_v17  ;;  %v649_v20 = vadd.f32 %v637_v12, %v193_v18  ;;  %v477_v21 = vpop.f32.mrb[2].mxu0  ;;  %v485_v22 = vpop.f32.mrb[2].mxu1 }
  0xe4   :  { %v226_v23 = vsub.f32 0.0, %v640_v15  ;;  %v234_v24 = vsub.f32 0.0, %v643_v16  ;;  %v654_v25 = vadd.f32 %v477_v21, %v637_v12  ;;  %v657_v26 = vadd.f32 %v485_v22, %v637_v12  ;;  %v164_v27 = vpop.f32.mrb[3].mxu0  ;;  %v196_v28 = vpop.f32.mrb[3].mxu1 }
  0xe5   :  { %v224_v29 = vsub.f32 0.0, %v646_v19  ;;  %v232_v30 = vsub.f32 0.0, %v649_v20  ;;  %v662_v31 = vadd.f32 %v637_v12, %v164_v27  ;;  %v665_v32 = vadd.f32 %v637_v12, %v196_v28 }
  0xe6   :  { %v244_v33 = vmul.f32 1.442695, %v226_v23  ;;  %v260_v34 = vmul.f32 1.442695, %v234_v24  ;;  %v227_v35 = vsub.f32 0.0, %v654_v25  ;;  %v235_v36 = vsub.f32 0.0, %v657_v26 }
  0xe7   :  { %v240_v37 = vmul.f32 1.442695, %v224_v29  ;;  %v256_v38 = vmul.f32 1.442695, %v232_v30  ;;  %v225_v39 = vsub.f32 0.0, %v662_v31  ;;  %v233_v40 = vsub.f32 0.0, %v665_v32 }
  0xe8   :  { %509 = vpow2.f32 %v244_v33  ;;  %v246_v41 = vmul.f32 1.442695, %v227_v35  ;;  %v262_v42 = vmul.f32 1.442695, %v235_v36 }
  0xe9   :  { %511 = vpow2.f32 %v260_v34  ;;  %v480_v43 = vpop.f32.mrb[4].mxu0  ;;  %v488_v44 = vpop.f32.mrb[4].mxu1  ;;  %v242_v45 = vmul.f32 1.442695, %v225_v39  ;;  %v258_v50 = vmul.f32 1.442695, %v233_v40 }
  0xea   :  { %513 = vpow2.f32 %v240_v37  ;;  %v672_v46 = vadd.f32 %v480_v43, %v637_v12  ;;  %v675_v47 = vadd.f32 %v488_v44, %v637_v12  ;;  %v177_v48 = vpop.f32.mrb[5].mxu0  ;;  %v209_v49 = vpop.f32.mrb[5].mxu1 }
  0xeb   :  { %515 = vpow2.f32 %v256_v38  ;;  %v678_v51 = vadd.f32 %v637_v12, %v177_v48  ;;  %v681_v52 = vadd.f32 %v637_v12, %v209_v49  ;;  %v481_v53 = vpop.f32.mrb[6].mxu0  ;;  %v489_v54 = vpop.f32.mrb[6].mxu1 }
  0xec   :  { %517 = vpow2.f32 %v246_v41  ;;  %v230_v55 = vsub.f32 0.0, %v672_v46  ;;  %v238_v56 = vsub.f32 0.0, %v675_v47  ;;  %v686_v57 = vadd.f32 %v481_v53, %v637_v12  ;;  %v180_v58 = vpop.f32.mrb[7].mxu0  ;;  %v212_v59 = vpop.f32.mrb[7].mxu1 }
  0xed   :  { %519 = vpow2.f32 %v262_v42  ;;  %v228_v60 = vsub.f32 0.0, %v678_v51  ;;  %v236_v61 = vsub.f32 0.0, %v681_v52  ;;  %v692_v14 = vadd.f32 %v489_v54, %v637_v12 }
  0xee   :  { %521 = vpow2.f32 %v242_v45  ;;  %v252_v62 = vmul.f32 1.442695, %v230_v55  ;;  %v268_v63 = vmul.f32 1.442695, %v238_v56  ;;  %v231_v0 = vsub.f32 0.0, %v686_v57 }
  0xef   :  { %523 = vpow2.f32 %v258_v50  ;;  %v248_v1 = vmul.f32 1.442695, %v228_v60  ;;  %v264_v2 = vmul.f32 1.442695, %v236_v61  ;;  %v695_v21 = vadd.f32 %v637_v12, %v180_v58 }
  0xf0   :  { %525 = vpow2.f32 %v252_v62  ;;  %v254_v3 = vmul.f32 1.442695, %v231_v0  ;;  %v698_v24 = vadd.f32 %v637_v12, %v212_v59  ;;  %v239_v33 = vsub.f32 0.0, %v692_v14 }
  0xf1   :  { %527 = vpow2.f32 %v268_v63  ;;  %v229_v36 = vsub.f32 0.0, %v695_v21 }
  0xf2   :  { %v510_v4 = vpop.eup %509  ;;  %529 = vpow2.f32 %v248_v1  ;;  %v237_v39 = vsub.f32 0.0, %v698_v24  ;;  %v270_v43 = vmul.f32 1.442695, %v239_v33 }
  0xf3   :  { %v512_v5 = vpop.eup %511  ;;  %v274_v6 = vadd.f32 1.0, %v510_v4  ;;  %531 = vpow2.f32 %v264_v2  ;;  %v250_v48 = vmul.f32 1.442695, %v229_v36 }
  0xf4   :  { %v514_v7 = vpop.eup %513  ;;  %v282_v8 = vadd.f32 1.0, %v512_v5  ;;  %533 = vpow2.f32 %v254_v3  ;;  %v266_v53 = vmul.f32 1.442695, %v237_v39 }
  0xf5   :  { %v516_v9 = vpop.eup %515  ;;  %535 = vrcp.f32 %v274_v6  ;;  %v272_v10 = vadd.f32 1.0, %v514_v7 }
  0xf6   :  { %v518_v11 = vpop.eup %517  ;;  %537 = vrcp.f32 %v282_v8  ;;  %v280_v13 = vadd.f32 1.0, %v516_v9 }
  0xf7   :  { %v520_v17 = vpop.eup %519  ;;  %539 = vrcp.f32 %v272_v10  ;;  %v275_v18 = vadd.f32 1.0, %v518_v11 }
  0xf8   :  { %v522_v22 = vpop.eup %521  ;;  %541 = vrcp.f32 %v280_v13  ;;  %v283_v23 = vadd.f32 1.0, %v520_v17 }
  0xf9   :  { %v524_v27 = vpop.eup %523  ;;  %543 = vrcp.f32 %v275_v18  ;;  %v273_v28 = vadd.f32 1.0, %v522_v22 }
  0xfa   :  { %v526_v29 = vpop.eup %525  ;;  %545 = vrcp.f32 %v283_v23  ;;  %v281_v30 = vadd.f32 1.0, %v524_v27 }
  0xfb   :  { %v528_v34 = vpop.eup %527  ;;  %547 = vrcp.f32 %v273_v28  ;;  %v278_v35 = vadd.f32 1.0, %v526_v29 }
  0xfc   :  { %v530_v37 = vpop.eup %529  ;;  %549 = vrcp.f32 %v281_v30  ;;  %v286_v38 = vadd.f32 1.0, %v528_v34 }
  0xfd   :  { %v532_v12 = vpop.eup %531  ;;  %551 = vrcp.f32 %v278_v35  ;;  %v276_v40 = vadd.f32 1.0, %v530_v37 }
  0xfe   :  { %v534_v41 = vpop.eup %533  ;;  %553 = vrcp.f32 %v286_v38  ;;  %v284_v42 = vadd.f32 1.0, %v532_v12 }
  0xff   :  { %v536_v44 = vpop.eup %535  ;;  %555 = vrcp.f32 %v276_v40  ;;  %v279_v45 = vadd.f32 1.0, %v534_v41 }
 0x100   :  { %v538_v49 = vpop.eup %537  ;;  %v306_v50 = vmul.f32 %v536_v44, %v640_v15  ;;  %557 = vrcp.f32 %v284_v42 }
 0x101   :  { %v540_v54 = vpop.eup %539  ;;  %v314_v55 = vmul.f32 %v538_v49, %v643_v16  ;;  %559 = vrcp.f32 %v279_v45 }
 0x102   :  { %v542_v56 = vpop.eup %541  ;;  %v443_v58 = vpack.c.bf16 %v306_v50, %v306_v50  ;;  %v304_v59 = vmul.f32 %v540_v54, %v646_v19  ;;  %561 = vpow2.f32 %v270_v43 }
 0x103   :  { %v544_v60 = vpop.eup %543  ;;  %v451_v61 = vpack.c.bf16 %v314_v55, %v314_v55  ;;  %v312_v62 = vmul.f32 %v542_v56, %v649_v20  ;;  %563 = vpow2.f32 %v250_v48 }
 0x104   :  { %v546_v63 = vpop.eup %545  ;;  %387 = vst.msk [vmem:[%s786_s3 + $0x8] sm:$0xf] %vm384_vm2, %v443_v58  ;;  %v441_v15 = vpack.c.bf16 %v304_v59, %v304_v59  ;;  %v307_v16 = vmul.f32 %v544_v60, %v654_v25  ;;  %565 = vpow2.f32 %v266_v53 }
 0x105   :  { %v548_v0 = vpop.eup %547  ;;  %395 = vst.msk [vmem:[%s786_s3 + $0x28] sm:$0xf] %vm384_vm2, %v451_v61  ;;  %v449_v19 = vpack.c.bf16 %v312_v62, %v312_v62  ;;  %v315_v20 = vmul.f32 %v546_v63, %v657_v26 }
 0x106   :  { %v550_v1 = vpop.eup %549  ;;  %385 = vst.msk [vmem:[%s786_s3] sm:$0xf] %vm384_vm2, %v441_v15  ;;  %v444_v2 = vpack.c.bf16 %v307_v16, %v307_v16  ;;  %v305_v3 = vmul.f32 %v548_v0, %v662_v31 }
 0x107   :  { %v552_v25 = vpop.eup %551  ;;  %393 = vst.msk [vmem:[%s786_s3 + $0x20] sm:$0xf] %vm384_vm2, %v449_v19  ;;  %v452_v4 = vpack.c.bf16 %v315_v20, %v315_v20  ;;  %v313_v5 = vmul.f32 %v550_v1, %v665_v32 }
 0x108   :  { %v554_v6 = vpop.eup %553  ;;  %388 = vst.msk [vmem:[%s786_s3 + $0xc] sm:$0xf] %vm384_vm2, %v444_v2  ;;  %v442_v26 = vpack.c.bf16 %v305_v3, %v305_v3  ;;  %v310_v7 = vmul.f32 %v552_v25, %v672_v46 }
 0x109   :  { %v556_v8 = vpop.eup %555  ;;  %396 = vst.msk [vmem:[%s786_s3 + $0x2c] sm:$0xf] %vm384_vm2, %v452_v4  ;;  %v450_v31 = vpack.c.bf16 %v313_v5, %v313_v5  ;;  %v318_v9 = vmul.f32 %v554_v6, %v675_v47 }
 0x10a   :  { %v558_v10 = vpop.eup %557  ;;  %386 = vst.msk [vmem:[%s786_s3 + $0x4] sm:$0xf] %vm384_vm2, %v442_v26  ;;  %v447_v32 = vpack.c.bf16 %v310_v7, %v310_v7  ;;  %v308_v11 = vmul.f32 %v556_v8, %v678_v51 }
 0x10b   :  { %v560_v13 = vpop.eup %559  ;;  %394 = vst.msk [vmem:[%s786_s3 + $0x24] sm:$0xf] %vm384_vm2, %v450_v31  ;;  %v455_v46 = vpack.c.bf16 %v318_v9, %v318_v9  ;;  %v316_v17 = vmul.f32 %v558_v10, %v681_v52 }
 0x10c   :  { %v562_v18 = vpop.eup %561  ;;  %391 = vst.msk [vmem:[%s786_s3 + $0x18] sm:$0xf] %vm384_vm2, %v447_v32  ;;  %v445_v47 = vpack.c.bf16 %v308_v11, %v308_v11  ;;  %v311_v22 = vmul.f32 %v560_v13, %v686_v57 }
 0x10d   :  { %v564_v23 = vpop.eup %563  ;;  %399 = vst.msk [vmem:[%s786_s3 + $0x38] sm:$0xf] %vm384_vm2, %v455_v46  ;;  %v453_v51 = vpack.c.bf16 %v316_v17, %v316_v17  ;;  %v287_v27 = vadd.f32 1.0, %v562_v18 }
 0x10e   :  { %v566_v28 = vpop.eup %565  ;;  %389 = vst.msk [vmem:[%s786_s3 + $0x10] sm:$0xf] %vm384_vm2, %v445_v47  ;;  %v448_v52 = vpack.c.bf16 %v311_v22, %v311_v22  ;;  %v277_v29 = vadd.f32 1.0, %v564_v23 }
 0x10f   :  { %397 = vst.msk [vmem:[%s786_s3 + $0x30] sm:$0xf] %vm384_vm2, %v453_v51  ;;  %567 = vrcp.f32 %v287_v27  ;;  %v285_v57 = vadd.f32 1.0, %v566_v28 }
 0x110   :  { %392 = vst.msk [vmem:[%s786_s3 + $0x1c] sm:$0xf] %vm384_vm2, %v448_v52  ;;  %569 = vrcp.f32 %v277_v29 }
 0x111   :  { %571 = vrcp.f32 %v285_v57 }
 0x119   :  { %v568_v30 = vpop.eup %567 }
 0x11a   :  { %v570_v33 = vpop.eup %569  ;;  %v319_v34 = vmul.f32 %v568_v30, %v692_v14 }
 0x11b   :  { %v572_v35 = vpop.eup %571  ;;  %v309_v36 = vmul.f32 %v570_v33, %v695_v21 }
 0x11c   :  { %v456_v37 = vpack.c.bf16 %v319_v34, %v319_v34  ;;  %v317_v38 = vmul.f32 %v572_v35, %v698_v24 }
 0x11d   :  { %v446_v39 = vpack.c.bf16 %v309_v36, %v309_v36 }
 0x11e   :  { %400 = vst.msk [vmem:[%s786_s3 + $0x3c] sm:$0xf] %vm384_vm2, %v456_v37  ;;  %v454_v12 = vpack.c.bf16 %v317_v38, %v317_v38 }
 0x11f   :  { %390 = vst.msk [vmem:[%s786_s3 + $0x14] sm:$0xf] %vm384_vm2, %v446_v39 }
 0x120   :  { %398 = vst.msk [vmem:[%s786_s3 + $0x34] sm:$0xf] %vm384_vm2, %v454_v12 }

</bundles_post_ra>
